<compile_context>
chip_gen: v7x
topology: tpu7x:2x2x1
jax: 0.10.0
libtpu: 0.0.40
codegen_flags: <defaults>
</compile_context>

<pallas_src>
import functools
import math

import jax
import jax.numpy as jnp
from jax.experimental import pallas as pl
from jax.experimental.pallas import tpu as pltpu


def attention_kernel(x_ref,                   # (B*T, C)
                     wq_ref, wk_ref, wv_ref,  # (nh, C, hd) each
                     bq_ref, bk_ref, bv_ref,  # (nh, 1, hd) each
                     wo_ref,                  # (nh, hd, C)
                     bo_ref,                  # (1, C)
                     o_ref,                   # (B*T, C)
                     *, batch, seq, n_head):
    M, C = x_ref.shape
    hd = C // n_head
    scale = 1.0 / math.sqrt(hd)

    x = x_ref[...]                                            # (M, C)

    # Causal mask built once, in additive form (2-D iota as required on TPU).
    qi = jax.lax.broadcasted_iota(jnp.int32, (seq, seq), 0)
    kj = jax.lax.broadcasted_iota(jnp.int32, (seq, seq), 1)
    neg_mask = jnp.where(kj <= qi, 0.0, -1e30).astype(jnp.float32)   # (T, T)

    # c_proj accumulator, seeded with the output bias (saves a final add pass).
    acc = jnp.broadcast_to(bo_ref[...], (M, C)).astype(jnp.float32)

    for h in range(n_head):                                   # static unroll (nh small)
        # Per-head projections on the whole (B*T, C) slab — lane-aligned outputs.
        # Fold the 1/sqrt(hd) scale into q here: one (M, hd) mul per head instead
        # of a (T, T) mul per batch tile.
        qh = (jnp.dot(x, wq_ref[h], preferred_element_type=jnp.float32)
              + bq_ref[h]) * scale
        kh = jnp.dot(x, wk_ref[h], preferred_element_type=jnp.float32) + bk_ref[h]
        vh = jnp.dot(x, wv_ref[h], preferred_element_type=jnp.float32) + bv_ref[h]

        y_rows = []
        for b in range(batch):                                # static unroll over batch
            lo = b * seq                                      # static sublane slice
            qb = qh[lo:lo + seq]                              # (T, hd)
            kb = kh[lo:lo + seq]
            vb = vh[lo:lo + seq]

            # scores = q @ k^T without an explicit transpose: contract last axes.
            s = jax.lax.dot_general(
                qb, kb, (((1,), (1,)), ((), ())),
                preferred_element_type=jnp.float32)           # (T, T), already scaled via q
            s = s + neg_mask                                  # additive causal mask
            s = s - jnp.max(s, axis=-1, keepdims=True)
            p = jnp.exp(s)
            p = p * pl.reciprocal(jnp.sum(p, axis=-1, keepdims=True), approx=True)

            y_rows.append(jnp.dot(p, vb, preferred_element_type=jnp.float32))  # (T, hd)

        yh = jnp.concatenate(y_rows, axis=0)                  # (M, hd) — sublane concat
        # Fold c_proj into the head loop: acc += yh @ wo[h]
        acc = acc + jnp.dot(yh, wo_ref[h], preferred_element_type=jnp.float32)

    o_ref[...] = acc.astype(o_ref.dtype)


def causal_self_attention(x, wqkv, bqkv, wo, bo, n_head):
    """x: (B, T, C); wqkv: (C, 3C); bqkv: (3C,); wo: (C, C); bo: (C,)."""
    B, T, C = x.shape
    assert C % n_head == 0
    hd = C // n_head
    M = B * T

    # ---- host-side (free) weight re-layout: per-head, lane-aligned ----
    def split_heads_w(w):                                     # (C, C) -> (nh, C, hd)
        return w.reshape(C, n_head, hd).transpose(1, 0, 2)

    def split_heads_b(b):                                     # (C,) -> (nh, 1, hd)
        return b.reshape(n_head, 1, hd)

    wq = split_heads_w(wqkv[:, 0 * C:1 * C])
    wk = split_heads_w(wqkv[:, 1 * C:2 * C])
    wv = split_heads_w(wqkv[:, 2 * C:3 * C])
    bq = split_heads_b(bqkv[0 * C:1 * C])
    bk = split_heads_b(bqkv[1 * C:2 * C])
    bv = split_heads_b(bqkv[2 * C:3 * C])
    woh = wo.reshape(n_head, hd, C)                           # rows h*hd..(h+1)*hd of wo
    bo2 = bo.reshape(1, C)

    x2 = x.reshape(M, C)                                      # fold batch (wrapper reshape is free)

    kernel = functools.partial(attention_kernel, batch=B, seq=T, n_head=n_head)

    vmem = pl.BlockSpec(memory_space=pltpu.MemorySpace.VMEM)  # whole array resident in VMEM
    out = pl.pallas_call(
        kernel,
        out_shape=jax.ShapeDtypeStruct((M, C), x.dtype),
        in_specs=[vmem] * 9,
        out_specs=vmem,
    )(x2, wq, wk, wv, bq, bk, bv, woh, bo2)

    return out.reshape(B, T, C)


# ---------------- pure-JAX reference (mirrors the PyTorch module) ----------------
def attention_ref(x, wqkv, bqkv, wo, bo, n_head):
    B, T, C = x.shape
    hd = C // n_head
    qkv = x @ wqkv + bqkv
    q, k, v = jnp.split(qkv, 3, axis=-1)
    q = q.reshape(B, T, n_head, hd).transpose(0, 2, 1, 3)
    k = k.reshape(B, T, n_head, hd).transpose(0, 2, 1, 3)
    v = v.reshape(B, T, n_head, hd).transpose(0, 2, 1, 3)
    s = jnp.einsum('bhqd,bhkd->bhqk', q, k) / math.sqrt(hd)
    mask = jnp.tril(jnp.ones((T, T), dtype=bool))
    s = jnp.where(mask[None, None], s, -jnp.inf)
    p = jax.nn.softmax(s, axis=-1)
    y = jnp.einsum('bhqk,bhkd->bhqd', p, v).transpose(0, 2, 1, 3).reshape(B, T, C)
    return y @ wo + bo


if __name__ == "__main__":
    B, T, C, NH = 2, 8, 32, 4     # batch, seq, n_embd, n_head  (head_dim = 8)
    key = jax.random.PRNGKey(0)
    k0, k1, k2, k3, k4 = jax.random.split(key, 5)

    x = jax.random.normal(k0, (B, T, C), dtype=jnp.float32)

    std = 0.02
    wqkv = std * jax.random.normal(k1, (C, 3 * C), jnp.float32)   # c_attn W (in, out)
    bqkv = std * jax.random.normal(k2, (3 * C,), jnp.float32)     # c_attn b
    wo = std * jax.random.normal(k3, (C, C), jnp.float32)         # c_proj W (in, out)
    bo = std * jax.random.normal(k4, (C,), jnp.float32)           # c_proj b

    out = causal_self_attention(x, wqkv, bqkv, wo, bo, NH)
    out = jax.block_until_ready(out)

    ref = attention_ref(x, wqkv, bqkv, wo, bo, NH)
    assert out.shape == (B, T, C)
    assert jnp.allclose(out, ref, atol=1e-3, rtol=1e-3), "mismatch vs reference"

    print("KERNEL_OK")
</pallas_src>

<mosaic_0001>
module attributes {stable_mosaic.version = 11 : i64} {
  func.func @attention_kernel(%arg0: memref<16x32xf32, #tpu.memory_space<vmem>>, %arg1: memref<4x32x8xf32, #tpu.memory_space<vmem>>, %arg2: memref<4x32x8xf32, #tpu.memory_space<vmem>>, %arg3: memref<4x32x8xf32, #tpu.memory_space<vmem>>, %arg4: memref<4x1x8xf32, #tpu.memory_space<vmem>>, %arg5: memref<4x1x8xf32, #tpu.memory_space<vmem>>, %arg6: memref<4x1x8xf32, #tpu.memory_space<vmem>>, %arg7: memref<4x8x32xf32, #tpu.memory_space<vmem>>, %arg8: memref<1x32xf32, #tpu.memory_space<vmem>>, %arg9: memref<16x32xf32, #tpu.memory_space<vmem>>) attributes {dimension_semantics = [], scalar_prefetch = 0 : i64, scratch_operands = 0 : i64, tpu.core_type = #tpu.core_type<tc>} {
    %c0 = arith.constant 0 : index
    %c0_0 = arith.constant 0 : index
    %0 = vector.load %arg0[%c0, %c0_0] : memref<16x32xf32, #tpu.memory_space<vmem>>, vector<16x32xf32>
    %1 = tpu.iota {dimensions = array<i32: 0>} : vector<8x8xi32>
    %2 = tpu.iota {dimensions = array<i32: 1>} : vector<8x8xi32>
    %3 = arith.cmpi sle, %2, %1 : vector<8x8xi32>
    %cst = arith.constant 0.000000e+00 : f32
    %cst_1 = arith.constant -1.000000e+30 : f32
    %4 = vector.broadcast %cst : f32 to vector<8x8xf32>
    %5 = vector.broadcast %cst_1 : f32 to vector<8x8xf32>
    %6 = arith.select %3, %4, %5 : vector<8x8xi1>, vector<8x8xf32>
    %c0_2 = arith.constant 0 : index
    %c0_3 = arith.constant 0 : index
    %7 = vector.load %arg8[%c0_2, %c0_3] : memref<1x32xf32, #tpu.memory_space<vmem>>, vector<1x32xf32>
    %8 = vector.shape_cast %7 : vector<1x32xf32> to vector<1x32xf32>
    %9 = vector.broadcast %8 : vector<1x32xf32> to vector<16x32xf32>
    %c0_4 = arith.constant 0 : index
    %c0_5 = arith.constant 0 : index
    %c0_6 = arith.constant 0 : index
    %10 = vector.load %arg1[%c0_4, %c0_5, %c0_6] : memref<4x32x8xf32, #tpu.memory_space<vmem>>, vector<1x32x8xf32>
    %11 = vector.shape_cast %10 : vector<1x32x8xf32> to vector<32x8xf32>
    %cst_7 = arith.constant dense<0.000000e+00> : vector<16x8xf32>
    %12 = tpu.matmul %0, %11, %cst_7 {dimension_numbers = #tpu.dot_dimension_numbers<[1], [0], [0], [1], [0, 0, 1, 1], [], []>} : vector<16x32xf32>, vector<32x8xf32>, vector<16x8xf32> -> vector<16x8xf32>
    %c0_8 = arith.constant 0 : index
    %c0_9 = arith.constant 0 : index
    %c0_10 = arith.constant 0 : index
    %13 = vector.load %arg4[%c0_8, %c0_9, %c0_10] : memref<4x1x8xf32, #tpu.memory_space<vmem>>, vector<1x1x8xf32>
    %14 = vector.shape_cast %13 : vector<1x1x8xf32> to vector<1x8xf32>
    %15 = vector.broadcast %14 : vector<1x8xf32> to vector<16x8xf32>
    %16 = arith.addf %12, %15 : vector<16x8xf32>
    %cst_11 = arith.constant 0.353553385 : f32
    %17 = vector.broadcast %cst_11 : f32 to vector<16x8xf32>
    %18 = arith.mulf %16, %17 : vector<16x8xf32>
    %c0_12 = arith.constant 0 : index
    %c0_13 = arith.constant 0 : index
    %c0_14 = arith.constant 0 : index
    %19 = vector.load %arg2[%c0_12, %c0_13, %c0_14] : memref<4x32x8xf32, #tpu.memory_space<vmem>>, vector<1x32x8xf32>
    %20 = vector.shape_cast %19 : vector<1x32x8xf32> to vector<32x8xf32>
    %cst_15 = arith.constant dense<0.000000e+00> : vector<16x8xf32>
    %21 = tpu.matmul %0, %20, %cst_15 {dimension_numbers = #tpu.dot_dimension_numbers<[1], [0], [0], [1], [0, 0, 1, 1], [], []>} : vector<16x32xf32>, vector<32x8xf32>, vector<16x8xf32> -> vector<16x8xf32>
    %c0_16 = arith.constant 0 : index
    %c0_17 = arith.constant 0 : index
    %c0_18 = arith.constant 0 : index
    %22 = vector.load %arg5[%c0_16, %c0_17, %c0_18] : memref<4x1x8xf32, #tpu.memory_space<vmem>>, vector<1x1x8xf32>
    %23 = vector.shape_cast %22 : vector<1x1x8xf32> to vector<1x8xf32>
    %24 = vector.broadcast %23 : vector<1x8xf32> to vector<16x8xf32>
    %25 = arith.addf %21, %24 : vector<16x8xf32>
    %c0_19 = arith.constant 0 : index
    %c0_20 = arith.constant 0 : index
    %c0_21 = arith.constant 0 : index
    %26 = vector.load %arg3[%c0_19, %c0_20, %c0_21] : memref<4x32x8xf32, #tpu.memory_space<vmem>>, vector<1x32x8xf32>
    %27 = vector.shape_cast %26 : vector<1x32x8xf32> to vector<32x8xf32>
    %cst_22 = arith.constant dense<0.000000e+00> : vector<16x8xf32>
    %28 = tpu.matmul %0, %27, %cst_22 {dimension_numbers = #tpu.dot_dimension_numbers<[1], [0], [0], [1], [0, 0, 1, 1], [], []>} : vector<16x32xf32>, vector<32x8xf32>, vector<16x8xf32> -> vector<16x8xf32>
    %c0_23 = arith.constant 0 : index
    %c0_24 = arith.constant 0 : index
    %c0_25 = arith.constant 0 : index
    %29 = vector.load %arg6[%c0_23, %c0_24, %c0_25] : memref<4x1x8xf32, #tpu.memory_space<vmem>>, vector<1x1x8xf32>
    %30 = vector.shape_cast %29 : vector<1x1x8xf32> to vector<1x8xf32>
    %31 = vector.broadcast %30 : vector<1x8xf32> to vector<16x8xf32>
    %32 = arith.addf %28, %31 : vector<16x8xf32>
    %33 = vector.extract_strided_slice %18 {offsets = [0, 0], sizes = [8, 8], strides = [1, 1]} : vector<16x8xf32> to vector<8x8xf32>
    %34 = vector.extract_strided_slice %25 {offsets = [0, 0], sizes = [8, 8], strides = [1, 1]} : vector<16x8xf32> to vector<8x8xf32>
    %35 = vector.extract_strided_slice %32 {offsets = [0, 0], sizes = [8, 8], strides = [1, 1]} : vector<16x8xf32> to vector<8x8xf32>
    %cst_26 = arith.constant dense<0.000000e+00> : vector<8x8xf32>
    %36 = tpu.matmul %33, %34, %cst_26 {dimension_numbers = #tpu.dot_dimension_numbers<[1], [1], [0], [0], [0, 0, 1, 0], [], []>} : vector<8x8xf32>, vector<8x8xf32>, vector<8x8xf32> -> vector<8x8xf32>
    %37 = arith.addf %36, %6 : vector<8x8xf32>
    %cst_27 = arith.constant dense<0xFF800000> : vector<8xf32>
    %38 = vector.multi_reduction <maximumf>, %37, %cst_27 [1] : vector<8x8xf32> to vector<8xf32>
    %39 = vector.shape_cast %38 : vector<8xf32> to vector<8x1xf32>
    %40 = vector.broadcast %39 : vector<8x1xf32> to vector<8x8xf32>
    %41 = arith.subf %37, %40 : vector<8x8xf32>
    %42 = math.exp %41 : vector<8x8xf32>
    %cst_28 = arith.constant dense<0.000000e+00> : vector<8xf32>
    %43 = vector.multi_reduction <add>, %42, %cst_28 [1] : vector<8x8xf32> to vector<8xf32>
    %44 = vector.shape_cast %43 : vector<8xf32> to vector<8x1xf32>
    %45 = tpu.reciprocal %44 {approx = true} : vector<8x1xf32> -> vector<8x1xf32>
    %46 = vector.broadcast %45 : vector<8x1xf32> to vector<8x8xf32>
    %47 = arith.mulf %42, %46 : vector<8x8xf32>
    %cst_29 = arith.constant dense<0.000000e+00> : vector<8x8xf32>
    %48 = tpu.matmul %47, %35, %cst_29 {dimension_numbers = #tpu.dot_dimension_numbers<[1], [0], [0], [1], [0, 0, 1, 1], [], []>} : vector<8x8xf32>, vector<8x8xf32>, vector<8x8xf32> -> vector<8x8xf32>
    %49 = vector.extract_strided_slice %18 {offsets = [8, 0], sizes = [8, 8], strides = [1, 1]} : vector<16x8xf32> to vector<8x8xf32>
    %50 = vector.extract_strided_slice %25 {offsets = [8, 0], sizes = [8, 8], strides = [1, 1]} : vector<16x8xf32> to vector<8x8xf32>
    %51 = vector.extract_strided_slice %32 {offsets = [8, 0], sizes = [8, 8], strides = [1, 1]} : vector<16x8xf32> to vector<8x8xf32>
    %cst_30 = arith.constant dense<0.000000e+00> : vector<8x8xf32>
    %52 = tpu.matmul %49, %50, %cst_30 {dimension_numbers = #tpu.dot_dimension_numbers<[1], [1], [0], [0], [0, 0, 1, 0], [], []>} : vector<8x8xf32>, vector<8x8xf32>, vector<8x8xf32> -> vector<8x8xf32>
    %53 = arith.addf %52, %6 : vector<8x8xf32>
    %cst_31 = arith.constant dense<0xFF800000> : vector<8xf32>
    %54 = vector.multi_reduction <maximumf>, %53, %cst_31 [1] : vector<8x8xf32> to vector<8xf32>
    %55 = vector.shape_cast %54 : vector<8xf32> to vector<8x1xf32>
    %56 = vector.broadcast %55 : vector<8x1xf32> to vector<8x8xf32>
    %57 = arith.subf %53, %56 : vector<8x8xf32>
    %58 = math.exp %57 : vector<8x8xf32>
    %cst_32 = arith.constant dense<0.000000e+00> : vector<8xf32>
    %59 = vector.multi_reduction <add>, %58, %cst_32 [1] : vector<8x8xf32> to vector<8xf32>
    %60 = vector.shape_cast %59 : vector<8xf32> to vector<8x1xf32>
    %61 = tpu.reciprocal %60 {approx = true} : vector<8x1xf32> -> vector<8x1xf32>
    %62 = vector.broadcast %61 : vector<8x1xf32> to vector<8x8xf32>
    %63 = arith.mulf %58, %62 : vector<8x8xf32>
    %cst_33 = arith.constant dense<0.000000e+00> : vector<8x8xf32>
    %64 = tpu.matmul %63, %51, %cst_33 {dimension_numbers = #tpu.dot_dimension_numbers<[1], [0], [0], [1], [0, 0, 1, 1], [], []>} : vector<8x8xf32>, vector<8x8xf32>, vector<8x8xf32> -> vector<8x8xf32>
    %65 = tpu.concatenate %48, %64 in 0 : vector<8x8xf32>, vector<8x8xf32> -> vector<16x8xf32>
    %c0_34 = arith.constant 0 : index
    %c0_35 = arith.constant 0 : index
    %c0_36 = arith.constant 0 : index
    %66 = vector.load %arg7[%c0_34, %c0_35, %c0_36] : memref<4x8x32xf32, #tpu.memory_space<vmem>>, vector<1x8x32xf32>
    %67 = vector.shape_cast %66 : vector<1x8x32xf32> to vector<8x32xf32>
    %cst_37 = arith.constant dense<0.000000e+00> : vector<16x32xf32>
    %68 = tpu.matmul %65, %67, %cst_37 {dimension_numbers = #tpu.dot_dimension_numbers<[1], [0], [0], [1], [0, 0, 1, 1], [], []>} : vector<16x8xf32>, vector<8x32xf32>, vector<16x32xf32> -> vector<16x32xf32>
    %69 = arith.addf %9, %68 : vector<16x32xf32>
    %c1 = arith.constant 1 : index
    %c0_38 = arith.constant 0 : index
    %c0_39 = arith.constant 0 : index
    %70 = vector.load %arg1[%c1, %c0_38, %c0_39] : memref<4x32x8xf32, #tpu.memory_space<vmem>>, vector<1x32x8xf32>
    %71 = vector.shape_cast %70 : vector<1x32x8xf32> to vector<32x8xf32>
    %cst_40 = arith.constant dense<0.000000e+00> : vector<16x8xf32>
    %72 = tpu.matmul %0, %71, %cst_40 {dimension_numbers = #tpu.dot_dimension_numbers<[1], [0], [0], [1], [0, 0, 1, 1], [], []>} : vector<16x32xf32>, vector<32x8xf32>, vector<16x8xf32> -> vector<16x8xf32>
    %c1_41 = arith.constant 1 : index
    %c0_42 = arith.constant 0 : index
    %c0_43 = arith.constant 0 : index
    %73 = vector.load %arg4[%c1_41, %c0_42, %c0_43] : memref<4x1x8xf32, #tpu.memory_space<vmem>>, vector<1x1x8xf32>
    %74 = vector.shape_cast %73 : vector<1x1x8xf32> to vector<1x8xf32>
    %75 = vector.broadcast %74 : vector<1x8xf32> to vector<16x8xf32>
    %76 = arith.addf %72, %75 : vector<16x8xf32>
    %cst_44 = arith.constant 0.353553385 : f32
    %77 = vector.broadcast %cst_44 : f32 to vector<16x8xf32>
    %78 = arith.mulf %76, %77 : vector<16x8xf32>
    %c1_45 = arith.constant 1 : index
    %c0_46 = arith.constant 0 : index
    %c0_47 = arith.constant 0 : index
    %79 = vector.load %arg2[%c1_45, %c0_46, %c0_47] : memref<4x32x8xf32, #tpu.memory_space<vmem>>, vector<1x32x8xf32>
    %80 = vector.shape_cast %79 : vector<1x32x8xf32> to vector<32x8xf32>
    %cst_48 = arith.constant dense<0.000000e+00> : vector<16x8xf32>
    %81 = tpu.matmul %0, %80, %cst_48 {dimension_numbers = #tpu.dot_dimension_numbers<[1], [0], [0], [1], [0, 0, 1, 1], [], []>} : vector<16x32xf32>, vector<32x8xf32>, vector<16x8xf32> -> vector<16x8xf32>
    %c1_49 = arith.constant 1 : index
    %c0_50 = arith.constant 0 : index
    %c0_51 = arith.constant 0 : index
    %82 = vector.load %arg5[%c1_49, %c0_50, %c0_51] : memref<4x1x8xf32, #tpu.memory_space<vmem>>, vector<1x1x8xf32>
    %83 = vector.shape_cast %82 : vector<1x1x8xf32> to vector<1x8xf32>
    %84 = vector.broadcast %83 : vector<1x8xf32> to vector<16x8xf32>
    %85 = arith.addf %81, %84 : vector<16x8xf32>
    %c1_52 = arith.constant 1 : index
    %c0_53 = arith.constant 0 : index
    %c0_54 = arith.constant 0 : index
    %86 = vector.load %arg3[%c1_52, %c0_53, %c0_54] : memref<4x32x8xf32, #tpu.memory_space<vmem>>, vector<1x32x8xf32>
    %87 = vector.shape_cast %86 : vector<1x32x8xf32> to vector<32x8xf32>
    %cst_55 = arith.constant dense<0.000000e+00> : vector<16x8xf32>
    %88 = tpu.matmul %0, %87, %cst_55 {dimension_numbers = #tpu.dot_dimension_numbers<[1], [0], [0], [1], [0, 0, 1, 1], [], []>} : vector<16x32xf32>, vector<32x8xf32>, vector<16x8xf32> -> vector<16x8xf32>
    %c1_56 = arith.constant 1 : index
    %c0_57 = arith.constant 0 : index
    %c0_58 = arith.constant 0 : index
    %89 = vector.load %arg6[%c1_56, %c0_57, %c0_58] : memref<4x1x8xf32, #tpu.memory_space<vmem>>, vector<1x1x8xf32>
    %90 = vector.shape_cast %89 : vector<1x1x8xf32> to vector<1x8xf32>
    %91 = vector.broadcast %90 : vector<1x8xf32> to vector<16x8xf32>
    %92 = arith.addf %88, %91 : vector<16x8xf32>
    %93 = vector.extract_strided_slice %78 {offsets = [0, 0], sizes = [8, 8], strides = [1, 1]} : vector<16x8xf32> to vector<8x8xf32>
    %94 = vector.extract_strided_slice %85 {offsets = [0, 0], sizes = [8, 8], strides = [1, 1]} : vector<16x8xf32> to vector<8x8xf32>
    %95 = vector.extract_strided_slice %92 {offsets = [0, 0], sizes = [8, 8], strides = [1, 1]} : vector<16x8xf32> to vector<8x8xf32>
    %cst_59 = arith.constant dense<0.000000e+00> : vector<8x8xf32>
    %96 = tpu.matmul %93, %94, %cst_59 {dimension_numbers = #tpu.dot_dimension_numbers<[1], [1], [0], [0], [0, 0, 1, 0], [], []>} : vector<8x8xf32>, vector<8x8xf32>, vector<8x8xf32> -> vector<8x8xf32>
    %97 = arith.addf %96, %6 : vector<8x8xf32>
    %cst_60 = arith.constant dense<0xFF800000> : vector<8xf32>
    %98 = vector.multi_reduction <maximumf>, %97, %cst_60 [1] : vector<8x8xf32> to vector<8xf32>
    %99 = vector.shape_cast %98 : vector<8xf32> to vector<8x1xf32>
    %100 = vector.broadcast %99 : vector<8x1xf32> to vector<8x8xf32>
    %101 = arith.subf %97, %100 : vector<8x8xf32>
    %102 = math.exp %101 : vector<8x8xf32>
    %cst_61 = arith.constant dense<0.000000e+00> : vector<8xf32>
    %103 = vector.multi_reduction <add>, %102, %cst_61 [1] : vector<8x8xf32> to vector<8xf32>
    %104 = vector.shape_cast %103 : vector<8xf32> to vector<8x1xf32>
    %105 = tpu.reciprocal %104 {approx = true} : vector<8x1xf32> -> vector<8x1xf32>
    %106 = vector.broadcast %105 : vector<8x1xf32> to vector<8x8xf32>
    %107 = arith.mulf %102, %106 : vector<8x8xf32>
    %cst_62 = arith.constant dense<0.000000e+00> : vector<8x8xf32>
    %108 = tpu.matmul %107, %95, %cst_62 {dimension_numbers = #tpu.dot_dimension_numbers<[1], [0], [0], [1], [0, 0, 1, 1], [], []>} : vector<8x8xf32>, vector<8x8xf32>, vector<8x8xf32> -> vector<8x8xf32>
    %109 = vector.extract_strided_slice %78 {offsets = [8, 0], sizes = [8, 8], strides = [1, 1]} : vector<16x8xf32> to vector<8x8xf32>
    %110 = vector.extract_strided_slice %85 {offsets = [8, 0], sizes = [8, 8], strides = [1, 1]} : vector<16x8xf32> to vector<8x8xf32>
    %111 = vector.extract_strided_slice %92 {offsets = [8, 0], sizes = [8, 8], strides = [1, 1]} : vector<16x8xf32> to vector<8x8xf32>
    %cst_63 = arith.constant dense<0.000000e+00> : vector<8x8xf32>
    %112 = tpu.matmul %109, %110, %cst_63 {dimension_numbers = #tpu.dot_dimension_numbers<[1], [1], [0], [0], [0, 0, 1, 0], [], []>} : vector<8x8xf32>, vector<8x8xf32>, vector<8x8xf32> -> vector<8x8xf32>
    %113 = arith.addf %112, %6 : vector<8x8xf32>
    %cst_64 = arith.constant dense<0xFF800000> : vector<8xf32>
    %114 = vector.multi_reduction <maximumf>, %113, %cst_64 [1] : vector<8x8xf32> to vector<8xf32>
    %115 = vector.shape_cast %114 : vector<8xf32> to vector<8x1xf32>
    %116 = vector.broadcast %115 : vector<8x1xf32> to vector<8x8xf32>
    %117 = arith.subf %113, %116 : vector<8x8xf32>
    %118 = math.exp %117 : vector<8x8xf32>
    %cst_65 = arith.constant dense<0.000000e+00> : vector<8xf32>
    %119 = vector.multi_reduction <add>, %118, %cst_65 [1] : vector<8x8xf32> to vector<8xf32>
    %120 = vector.shape_cast %119 : vector<8xf32> to vector<8x1xf32>
    %121 = tpu.reciprocal %120 {approx = true} : vector<8x1xf32> -> vector<8x1xf32>
    %122 = vector.broadcast %121 : vector<8x1xf32> to vector<8x8xf32>
    %123 = arith.mulf %118, %122 : vector<8x8xf32>
    %cst_66 = arith.constant dense<0.000000e+00> : vector<8x8xf32>
    %124 = tpu.matmul %123, %111, %cst_66 {dimension_numbers = #tpu.dot_dimension_numbers<[1], [0], [0], [1], [0, 0, 1, 1], [], []>} : vector<8x8xf32>, vector<8x8xf32>, vector<8x8xf32> -> vector<8x8xf32>
    %125 = tpu.concatenate %108, %124 in 0 : vector<8x8xf32>, vector<8x8xf32> -> vector<16x8xf32>
    %c1_67 = arith.constant 1 : index
    %c0_68 = arith.constant 0 : index
    %c0_69 = arith.constant 0 : index
    %126 = vector.load %arg7[%c1_67, %c0_68, %c0_69] : memref<4x8x32xf32, #tpu.memory_space<vmem>>, vector<1x8x32xf32>
    %127 = vector.shape_cast %126 : vector<1x8x32xf32> to vector<8x32xf32>
    %cst_70 = arith.constant dense<0.000000e+00> : vector<16x32xf32>
    %128 = tpu.matmul %125, %127, %cst_70 {dimension_numbers = #tpu.dot_dimension_numbers<[1], [0], [0], [1], [0, 0, 1, 1], [], []>} : vector<16x8xf32>, vector<8x32xf32>, vector<16x32xf32> -> vector<16x32xf32>
    %129 = arith.addf %69, %128 : vector<16x32xf32>
    %c2 = arith.constant 2 : index
    %c0_71 = arith.constant 0 : index
    %c0_72 = arith.constant 0 : index
    %130 = vector.load %arg1[%c2, %c0_71, %c0_72] : memref<4x32x8xf32, #tpu.memory_space<vmem>>, vector<1x32x8xf32>
    %131 = vector.shape_cast %130 : vector<1x32x8xf32> to vector<32x8xf32>
    %cst_73 = arith.constant dense<0.000000e+00> : vector<16x8xf32>
    %132 = tpu.matmul %0, %131, %cst_73 {dimension_numbers = #tpu.dot_dimension_numbers<[1], [0], [0], [1], [0, 0, 1, 1], [], []>} : vector<16x32xf32>, vector<32x8xf32>, vector<16x8xf32> -> vector<16x8xf32>
    %c2_74 = arith.constant 2 : index
    %c0_75 = arith.constant 0 : index
    %c0_76 = arith.constant 0 : index
    %133 = vector.load %arg4[%c2_74, %c0_75, %c0_76] : memref<4x1x8xf32, #tpu.memory_space<vmem>>, vector<1x1x8xf32>
    %134 = vector.shape_cast %133 : vector<1x1x8xf32> to vector<1x8xf32>
    %135 = vector.broadcast %134 : vector<1x8xf32> to vector<16x8xf32>
    %136 = arith.addf %132, %135 : vector<16x8xf32>
    %cst_77 = arith.constant 0.353553385 : f32
    %137 = vector.broadcast %cst_77 : f32 to vector<16x8xf32>
    %138 = arith.mulf %136, %137 : vector<16x8xf32>
    %c2_78 = arith.constant 2 : index
    %c0_79 = arith.constant 0 : index
    %c0_80 = arith.constant 0 : index
    %139 = vector.load %arg2[%c2_78, %c0_79, %c0_80] : memref<4x32x8xf32, #tpu.memory_space<vmem>>, vector<1x32x8xf32>
    %140 = vector.shape_cast %139 : vector<1x32x8xf32> to vector<32x8xf32>
    %cst_81 = arith.constant dense<0.000000e+00> : vector<16x8xf32>
    %141 = tpu.matmul %0, %140, %cst_81 {dimension_numbers = #tpu.dot_dimension_numbers<[1], [0], [0], [1], [0, 0, 1, 1], [], []>} : vector<16x32xf32>, vector<32x8xf32>, vector<16x8xf32> -> vector<16x8xf32>
    %c2_82 = arith.constant 2 : index
    %c0_83 = arith.constant 0 : index
    %c0_84 = arith.constant 0 : index
    %142 = vector.load %arg5[%c2_82, %c0_83, %c0_84] : memref<4x1x8xf32, #tpu.memory_space<vmem>>, vector<1x1x8xf32>
    %143 = vector.shape_cast %142 : vector<1x1x8xf32> to vector<1x8xf32>
    %144 = vector.broadcast %143 : vector<1x8xf32> to vector<16x8xf32>
    %145 = arith.addf %141, %144 : vector<16x8xf32>
    %c2_85 = arith.constant 2 : index
    %c0_86 = arith.constant 0 : index
    %c0_87 = arith.constant 0 : index
    %146 = vector.load %arg3[%c2_85, %c0_86, %c0_87] : memref<4x32x8xf32, #tpu.memory_space<vmem>>, vector<1x32x8xf32>
    %147 = vector.shape_cast %146 : vector<1x32x8xf32> to vector<32x8xf32>
    %cst_88 = arith.constant dense<0.000000e+00> : vector<16x8xf32>
    %148 = tpu.matmul %0, %147, %cst_88 {dimension_numbers = #tpu.dot_dimension_numbers<[1], [0], [0], [1], [0, 0, 1, 1], [], []>} : vector<16x32xf32>, vector<32x8xf32>, vector<16x8xf32> -> vector<16x8xf32>
    %c2_89 = arith.constant 2 : index
    %c0_90 = arith.constant 0 : index
    %c0_91 = arith.constant 0 : index
    %149 = vector.load %arg6[%c2_89, %c0_90, %c0_91] : memref<4x1x8xf32, #tpu.memory_space<vmem>>, vector<1x1x8xf32>
    %150 = vector.shape_cast %149 : vector<1x1x8xf32> to vector<1x8xf32>
    %151 = vector.broadcast %150 : vector<1x8xf32> to vector<16x8xf32>
    %152 = arith.addf %148, %151 : vector<16x8xf32>
    %153 = vector.extract_strided_slice %138 {offsets = [0, 0], sizes = [8, 8], strides = [1, 1]} : vector<16x8xf32> to vector<8x8xf32>
    %154 = vector.extract_strided_slice %145 {offsets = [0, 0], sizes = [8, 8], strides = [1, 1]} : vector<16x8xf32> to vector<8x8xf32>
    %155 = vector.extract_strided_slice %152 {offsets = [0, 0], sizes = [8, 8], strides = [1, 1]} : vector<16x8xf32> to vector<8x8xf32>
    %cst_92 = arith.constant dense<0.000000e+00> : vector<8x8xf32>
    %156 = tpu.matmul %153, %154, %cst_92 {dimension_numbers = #tpu.dot_dimension_numbers<[1], [1], [0], [0], [0, 0, 1, 0], [], []>} : vector<8x8xf32>, vector<8x8xf32>, vector<8x8xf32> -> vector<8x8xf32>
    %157 = arith.addf %156, %6 : vector<8x8xf32>
    %cst_93 = arith.constant dense<0xFF800000> : vector<8xf32>
    %158 = vector.multi_reduction <maximumf>, %157, %cst_93 [1] : vector<8x8xf32> to vector<8xf32>
    %159 = vector.shape_cast %158 : vector<8xf32> to vector<8x1xf32>
    %160 = vector.broadcast %159 : vector<8x1xf32> to vector<8x8xf32>
    %161 = arith.subf %157, %160 : vector<8x8xf32>
    %162 = math.exp %161 : vector<8x8xf32>
    %cst_94 = arith.constant dense<0.000000e+00> : vector<8xf32>
    %163 = vector.multi_reduction <add>, %162, %cst_94 [1] : vector<8x8xf32> to vector<8xf32>
    %164 = vector.shape_cast %163 : vector<8xf32> to vector<8x1xf32>
    %165 = tpu.reciprocal %164 {approx = true} : vector<8x1xf32> -> vector<8x1xf32>
    %166 = vector.broadcast %165 : vector<8x1xf32> to vector<8x8xf32>
    %167 = arith.mulf %162, %166 : vector<8x8xf32>
    %cst_95 = arith.constant dense<0.000000e+00> : vector<8x8xf32>
    %168 = tpu.matmul %167, %155, %cst_95 {dimension_numbers = #tpu.dot_dimension_numbers<[1], [0], [0], [1], [0, 0, 1, 1], [], []>} : vector<8x8xf32>, vector<8x8xf32>, vector<8x8xf32> -> vector<8x8xf32>
    %169 = vector.extract_strided_slice %138 {offsets = [8, 0], sizes = [8, 8], strides = [1, 1]} : vector<16x8xf32> to vector<8x8xf32>
    %170 = vector.extract_strided_slice %145 {offsets = [8, 0], sizes = [8, 8], strides = [1, 1]} : vector<16x8xf32> to vector<8x8xf32>
    %171 = vector.extract_strided_slice %152 {offsets = [8, 0], sizes = [8, 8], strides = [1, 1]} : vector<16x8xf32> to vector<8x8xf32>
    %cst_96 = arith.constant dense<0.000000e+00> : vector<8x8xf32>
    %172 = tpu.matmul %169, %170, %cst_96 {dimension_numbers = #tpu.dot_dimension_numbers<[1], [1], [0], [0], [0, 0, 1, 0], [], []>} : vector<8x8xf32>, vector<8x8xf32>, vector<8x8xf32> -> vector<8x8xf32>
    %173 = arith.addf %172, %6 : vector<8x8xf32>
    %cst_97 = arith.constant dense<0xFF800000> : vector<8xf32>
    %174 = vector.multi_reduction <maximumf>, %173, %cst_97 [1] : vector<8x8xf32> to vector<8xf32>
    %175 = vector.shape_cast %174 : vector<8xf32> to vector<8x1xf32>
    %176 = vector.broadcast %175 : vector<8x1xf32> to vector<8x8xf32>
    %177 = arith.subf %173, %176 : vector<8x8xf32>
    %178 = math.exp %177 : vector<8x8xf32>
    %cst_98 = arith.constant dense<0.000000e+00> : vector<8xf32>
    %179 = vector.multi_reduction <add>, %178, %cst_98 [1] : vector<8x8xf32> to vector<8xf32>
    %180 = vector.shape_cast %179 : vector<8xf32> to vector<8x1xf32>
    %181 = tpu.reciprocal %180 {approx = true} : vector<8x1xf32> -> vector<8x1xf32>
    %182 = vector.broadcast %181 : vector<8x1xf32> to vector<8x8xf32>
    %183 = arith.mulf %178, %182 : vector<8x8xf32>
    %cst_99 = arith.constant dense<0.000000e+00> : vector<8x8xf32>
    %184 = tpu.matmul %183, %171, %cst_99 {dimension_numbers = #tpu.dot_dimension_numbers<[1], [0], [0], [1], [0, 0, 1, 1], [], []>} : vector<8x8xf32>, vector<8x8xf32>, vector<8x8xf32> -> vector<8x8xf32>
    %185 = tpu.concatenate %168, %184 in 0 : vector<8x8xf32>, vector<8x8xf32> -> vector<16x8xf32>
    %c2_100 = arith.constant 2 : index
    %c0_101 = arith.constant 0 : index
    %c0_102 = arith.constant 0 : index
    %186 = vector.load %arg7[%c2_100, %c0_101, %c0_102] : memref<4x8x32xf32, #tpu.memory_space<vmem>>, vector<1x8x32xf32>
    %187 = vector.shape_cast %186 : vector<1x8x32xf32> to vector<8x32xf32>
    %cst_103 = arith.constant dense<0.000000e+00> : vector<16x32xf32>
    %188 = tpu.matmul %185, %187, %cst_103 {dimension_numbers = #tpu.dot_dimension_numbers<[1], [0], [0], [1], [0, 0, 1, 1], [], []>} : vector<16x8xf32>, vector<8x32xf32>, vector<16x32xf32> -> vector<16x32xf32>
    %189 = arith.addf %129, %188 : vector<16x32xf32>
    %c3 = arith.constant 3 : index
    %c0_104 = arith.constant 0 : index
    %c0_105 = arith.constant 0 : index
    %190 = vector.load %arg1[%c3, %c0_104, %c0_105] : memref<4x32x8xf32, #tpu.memory_space<vmem>>, vector<1x32x8xf32>
    %191 = vector.shape_cast %190 : vector<1x32x8xf32> to vector<32x8xf32>
    %cst_106 = arith.constant dense<0.000000e+00> : vector<16x8xf32>
    %192 = tpu.matmul %0, %191, %cst_106 {dimension_numbers = #tpu.dot_dimension_numbers<[1], [0], [0], [1], [0, 0, 1, 1], [], []>} : vector<16x32xf32>, vector<32x8xf32>, vector<16x8xf32> -> vector<16x8xf32>
    %c3_107 = arith.constant 3 : index
    %c0_108 = arith.constant 0 : index
    %c0_109 = arith.constant 0 : index
    %193 = vector.load %arg4[%c3_107, %c0_108, %c0_109] : memref<4x1x8xf32, #tpu.memory_space<vmem>>, vector<1x1x8xf32>
    %194 = vector.shape_cast %193 : vector<1x1x8xf32> to vector<1x8xf32>
    %195 = vector.broadcast %194 : vector<1x8xf32> to vector<16x8xf32>
    %196 = arith.addf %192, %195 : vector<16x8xf32>
    %cst_110 = arith.constant 0.353553385 : f32
    %197 = vector.broadcast %cst_110 : f32 to vector<16x8xf32>
    %198 = arith.mulf %196, %197 : vector<16x8xf32>
    %c3_111 = arith.constant 3 : index
    %c0_112 = arith.constant 0 : index
    %c0_113 = arith.constant 0 : index
    %199 = vector.load %arg2[%c3_111, %c0_112, %c0_113] : memref<4x32x8xf32, #tpu.memory_space<vmem>>, vector<1x32x8xf32>
    %200 = vector.shape_cast %199 : vector<1x32x8xf32> to vector<32x8xf32>
    %cst_114 = arith.constant dense<0.000000e+00> : vector<16x8xf32>
    %201 = tpu.matmul %0, %200, %cst_114 {dimension_numbers = #tpu.dot_dimension_numbers<[1], [0], [0], [1], [0, 0, 1, 1], [], []>} : vector<16x32xf32>, vector<32x8xf32>, vector<16x8xf32> -> vector<16x8xf32>
    %c3_115 = arith.constant 3 : index
    %c0_116 = arith.constant 0 : index
    %c0_117 = arith.constant 0 : index
    %202 = vector.load %arg5[%c3_115, %c0_116, %c0_117] : memref<4x1x8xf32, #tpu.memory_space<vmem>>, vector<1x1x8xf32>
    %203 = vector.shape_cast %202 : vector<1x1x8xf32> to vector<1x8xf32>
    %204 = vector.broadcast %203 : vector<1x8xf32> to vector<16x8xf32>
    %205 = arith.addf %201, %204 : vector<16x8xf32>
    %c3_118 = arith.constant 3 : index
    %c0_119 = arith.constant 0 : index
    %c0_120 = arith.constant 0 : index
    %206 = vector.load %arg3[%c3_118, %c0_119, %c0_120] : memref<4x32x8xf32, #tpu.memory_space<vmem>>, vector<1x32x8xf32>
    %207 = vector.shape_cast %206 : vector<1x32x8xf32> to vector<32x8xf32>
    %cst_121 = arith.constant dense<0.000000e+00> : vector<16x8xf32>
    %208 = tpu.matmul %0, %207, %cst_121 {dimension_numbers = #tpu.dot_dimension_numbers<[1], [0], [0], [1], [0, 0, 1, 1], [], []>} : vector<16x32xf32>, vector<32x8xf32>, vector<16x8xf32> -> vector<16x8xf32>
    %c3_122 = arith.constant 3 : index
    %c0_123 = arith.constant 0 : index
    %c0_124 = arith.constant 0 : index
    %209 = vector.load %arg6[%c3_122, %c0_123, %c0_124] : memref<4x1x8xf32, #tpu.memory_space<vmem>>, vector<1x1x8xf32>
    %210 = vector.shape_cast %209 : vector<1x1x8xf32> to vector<1x8xf32>
    %211 = vector.broadcast %210 : vector<1x8xf32> to vector<16x8xf32>
    %212 = arith.addf %208, %211 : vector<16x8xf32>
    %213 = vector.extract_strided_slice %198 {offsets = [0, 0], sizes = [8, 8], strides = [1, 1]} : vector<16x8xf32> to vector<8x8xf32>
    %214 = vector.extract_strided_slice %205 {offsets = [0, 0], sizes = [8, 8], strides = [1, 1]} : vector<16x8xf32> to vector<8x8xf32>
    %215 = vector.extract_strided_slice %212 {offsets = [0, 0], sizes = [8, 8], strides = [1, 1]} : vector<16x8xf32> to vector<8x8xf32>
    %cst_125 = arith.constant dense<0.000000e+00> : vector<8x8xf32>
    %216 = tpu.matmul %213, %214, %cst_125 {dimension_numbers = #tpu.dot_dimension_numbers<[1], [1], [0], [0], [0, 0, 1, 0], [], []>} : vector<8x8xf32>, vector<8x8xf32>, vector<8x8xf32> -> vector<8x8xf32>
    %217 = arith.addf %216, %6 : vector<8x8xf32>
    %cst_126 = arith.constant dense<0xFF800000> : vector<8xf32>
    %218 = vector.multi_reduction <maximumf>, %217, %cst_126 [1] : vector<8x8xf32> to vector<8xf32>
    %219 = vector.shape_cast %218 : vector<8xf32> to vector<8x1xf32>
    %220 = vector.broadcast %219 : vector<8x1xf32> to vector<8x8xf32>
    %221 = arith.subf %217, %220 : vector<8x8xf32>
    %222 = math.exp %221 : vector<8x8xf32>
    %cst_127 = arith.constant dense<0.000000e+00> : vector<8xf32>
    %223 = vector.multi_reduction <add>, %222, %cst_127 [1] : vector<8x8xf32> to vector<8xf32>
    %224 = vector.shape_cast %223 : vector<8xf32> to vector<8x1xf32>
    %225 = tpu.reciprocal %224 {approx = true} : vector<8x1xf32> -> vector<8x1xf32>
    %226 = vector.broadcast %225 : vector<8x1xf32> to vector<8x8xf32>
    %227 = arith.mulf %222, %226 : vector<8x8xf32>
    %cst_128 = arith.constant dense<0.000000e+00> : vector<8x8xf32>
    %228 = tpu.matmul %227, %215, %cst_128 {dimension_numbers = #tpu.dot_dimension_numbers<[1], [0], [0], [1], [0, 0, 1, 1], [], []>} : vector<8x8xf32>, vector<8x8xf32>, vector<8x8xf32> -> vector<8x8xf32>
    %229 = vector.extract_strided_slice %198 {offsets = [8, 0], sizes = [8, 8], strides = [1, 1]} : vector<16x8xf32> to vector<8x8xf32>
    %230 = vector.extract_strided_slice %205 {offsets = [8, 0], sizes = [8, 8], strides = [1, 1]} : vector<16x8xf32> to vector<8x8xf32>
    %231 = vector.extract_strided_slice %212 {offsets = [8, 0], sizes = [8, 8], strides = [1, 1]} : vector<16x8xf32> to vector<8x8xf32>
    %cst_129 = arith.constant dense<0.000000e+00> : vector<8x8xf32>
    %232 = tpu.matmul %229, %230, %cst_129 {dimension_numbers = #tpu.dot_dimension_numbers<[1], [1], [0], [0], [0, 0, 1, 0], [], []>} : vector<8x8xf32>, vector<8x8xf32>, vector<8x8xf32> -> vector<8x8xf32>
    %233 = arith.addf %232, %6 : vector<8x8xf32>
    %cst_130 = arith.constant dense<0xFF800000> : vector<8xf32>
    %234 = vector.multi_reduction <maximumf>, %233, %cst_130 [1] : vector<8x8xf32> to vector<8xf32>
    %235 = vector.shape_cast %234 : vector<8xf32> to vector<8x1xf32>
    %236 = vector.broadcast %235 : vector<8x1xf32> to vector<8x8xf32>
    %237 = arith.subf %233, %236 : vector<8x8xf32>
    %238 = math.exp %237 : vector<8x8xf32>
    %cst_131 = arith.constant dense<0.000000e+00> : vector<8xf32>
    %239 = vector.multi_reduction <add>, %238, %cst_131 [1] : vector<8x8xf32> to vector<8xf32>
    %240 = vector.shape_cast %239 : vector<8xf32> to vector<8x1xf32>
    %241 = tpu.reciprocal %240 {approx = true} : vector<8x1xf32> -> vector<8x1xf32>
    %242 = vector.broadcast %241 : vector<8x1xf32> to vector<8x8xf32>
    %243 = arith.mulf %238, %242 : vector<8x8xf32>
    %cst_132 = arith.constant dense<0.000000e+00> : vector<8x8xf32>
    %244 = tpu.matmul %243, %231, %cst_132 {dimension_numbers = #tpu.dot_dimension_numbers<[1], [0], [0], [1], [0, 0, 1, 1], [], []>} : vector<8x8xf32>, vector<8x8xf32>, vector<8x8xf32> -> vector<8x8xf32>
    %245 = tpu.concatenate %228, %244 in 0 : vector<8x8xf32>, vector<8x8xf32> -> vector<16x8xf32>
    %c3_133 = arith.constant 3 : index
    %c0_134 = arith.constant 0 : index
    %c0_135 = arith.constant 0 : index
    %246 = vector.load %arg7[%c3_133, %c0_134, %c0_135] : memref<4x8x32xf32, #tpu.memory_space<vmem>>, vector<1x8x32xf32>
    %247 = vector.shape_cast %246 : vector<1x8x32xf32> to vector<8x32xf32>
    %cst_136 = arith.constant dense<0.000000e+00> : vector<16x32xf32>
    %248 = tpu.matmul %245, %247, %cst_136 {dimension_numbers = #tpu.dot_dimension_numbers<[1], [0], [0], [1], [0, 0, 1, 1], [], []>} : vector<16x8xf32>, vector<8x32xf32>, vector<16x32xf32> -> vector<16x32xf32>
    %249 = arith.addf %189, %248 : vector<16x32xf32>
    %c0_137 = arith.constant 0 : index
    %c0_138 = arith.constant 0 : index
    %250 = vector.load %arg9[%c0_137, %c0_138] : memref<16x32xf32, #tpu.memory_space<vmem>>, vector<16x32xf32>
    tpu.vector_store %arg9[%c0_137, %c0_138], %249 {strides = array<i32>} : memref<16x32xf32, #tpu.memory_space<vmem>>, vector<16x32xf32>,
    return
  }
}

</mosaic_0001>

<bundles_post_ra>
// kernel: tpu_custom_call.1
= control target key start
LH: loop header
LB: loop body
LE: loop exit
PB: predicated region body
PF: predicated region fallthrough
CT: control target
= control target key end

     0   :  { %vm59_vm0 = vcmask 261120   ;;  %s3811_s0 = inlined_call_operand.vmem [shape: f32[16,32], index: 0, kind: input, shape index: {}]   ;;  %s3812_s1 = inlined_call_operand.vmem [shape: f32[4,32,8], index: 1, kind: input, shape index: {}]   ;;  %s3813_s2 = inlined_call_operand.vmem [shape: f32[4,32,8], index: 2, kind: input, shape index: {}]   ;;  %s3814_s3 = inlined_call_operand.vmem [shape: f32[4,32,8], index: 3, kind: input, shape index: {}]   ;;  %s3815_s4 = inlined_call_operand.vmem [shape: f32[4,1,8], index: 4, kind: input, shape index: {}]   ;;  %s3816_s5 = inlined_call_operand.vmem [shape: f32[4,1,8], index: 5, kind: input, shape index: {}]   ;;  %s3817_s6 = inlined_call_operand.vmem [shape: f32[4,1,8], index: 6, kind: input, shape index: {}]   ;;  %s3818_s7 = inlined_call_operand.vmem [shape: f32[4,8,32], index: 7, kind: input, shape index: {}]   ;;  %s3819_s8 = inlined_call_operand.vmem [shape: f32[1,32], index: 8, kind: input, shape index: {}]   ;;  %s3820_s9 = inlined_call_operand.hbm [shape: f32[16,32], index: 9, kind: output, shape index: {}]  }
   0x1   :  { %v48_v0 = vld [vmem:[%s3812_s1] sm:$0xff]  ;;  %v49_v1 = vld [vmem:[%s3812_s1 + $0x8] sm:$0xff]  ;;  %v50_v5 = vld [vmem:[%s3812_s1 + $0x10] sm:$0xff] }
   0x2   :  { %v143_v2 = vld [vmem:[%s3813_s2] sm:$0xff]  ;;  %v3216_v3 = vpack.c.bf16 %v49_v1, %v48_v0  ;;  %v144_v4 = vld [vmem:[%s3813_s2 + $0x8] sm:$0xff]  ;;  %v51_v6 = vld [vmem:[%s3812_s1 + $0x18] sm:$0xff] }
   0x3   :  { %v3224_v7 = vpack.c.bf16 %v144_v4, %v143_v2  ;;  %v3220_v8 = vpack.c.bf16 %v51_v6, %v50_v5  ;;  %v145_v9 = vld [vmem:[%s3813_s2 + $0x10] sm:$0xff]  ;;  %v146_v10 = vld [vmem:[%s3813_s2 + $0x18] sm:$0xff]  ;;  %v3465_v11 = vld [vmem:[%s3811_s0] sm:$0xff] }
   0x4   :  { %3217 = vmatprep.subr.bf16.mxu0 %v3216_v3  ;;  %v3228_v12 = vpack.c.bf16 %v146_v10, %v145_v9  ;;  %2992 = vmatprep.mubr.msk.f32.mxu0 %vm59_vm0, %v3465_v11 }
   0x5   :  { %14 = vsyncpa [#allocation3], 0  ;;  %3225 = vmatprep.subr.bf16.mxu1 %v3224_v7  ;;  %3219 = vmatpush3.bf16.msra.mxu0 %v3216_v3  ;;  %v3474_v13 = vld [vmem:[%s3811_s0 + $0x8] sm:$0xff]  ;;  %v3382_v14 = vmov 0.0   ;;  %vm3383_vm1 = vmmov 0   ;;  %vm315_vm2 = vcmask 64512   ;;  %v35_v32 = vlaneseq }
   0x6   :  { %3227 = vmatpush3.bf16.msra.mxu1 %v3224_v7  ;;  %3221 = vmatprep.subr.bf16.mxu0 %v3220_v8  ;;  %v2752_v15 = vld [vmem:[%s3815_s4] ss:$0 sm:$0xff]  ;;  %v230_v27 = vld [vmem:[%s3814_s3 + $0x8] sm:$0xff]  ;;  %v231_v28 = vld [vmem:[%s3814_s3 + $0x10] sm:$0xff]  ;;  %v3384_v35 = vmov -1e+30  }
   0x7   :  { %3229 = vmatprep.subr.bf16.mxu1 %v3228_v12  ;;  %3003 = vmatprep.mubr.msk.f32.mxu1 %vm59_vm0, %v3465_v11  ;;  %v2755_v16 = vld [vmem:[%s3816_s5] ss:$0 sm:$0xff]  ;;  %v232_v30 = vld [vmem:[%s3814_s3 + $0x18] sm:$0xff]  ;;  %v36_v33 = vshrl.u32 %v35_v32, 7  ;;  %v38_v34 = vand.u32 127, %v35_v32  ;;  %v2770_v7 = vld [vmem:[%s3812_s1 + $0x28] sm:$0xff] }
   0x8   :  { %v229_v26 = vld [vmem:[%s3814_s3] sm:$0xff]  ;;  %v3236_v31 = vpack.c.bf16 %v232_v30, %v231_v28  ;;  %v2778_v10 = vld [vmem:[%s3813_s2 + $0x28] sm:$0xff]  ;;  %s3385_s27 = smov [#allocation2]  }
   0x9   :  { %3223 = vmatpush3.bf16.msra.mxu0 %v3220_v8  ;;  %v3232_v29 = vpack.c.bf16 %v230_v27, %v229_v26  ;;  %vm39_vm3 = vcmp.le.s32.totalorder %v38_v34, %v36_v33  ;;  %v2758_v47 = vld [vmem:[%s3817_s6] ss:$0 sm:$0xff]  ;;  %s2740_s28 = sshll.u32 %s3385_s27, 4  ;;  %s2741_s28 = int_to_ptr.vmem [resolvable:$true] %s2740_s28 }
   0xa   :  { %3231 = vmatpush3.bf16.msra.mxu1 %v3228_v12  ;;  %v3510_v36 = vsel %vm39_vm3, 0.0, %v3384_v35  ;;  %v636_v2 = vld [vmem:[%s3818_s7] sm:$0xff]  ;;  %p3363_p1 = scmp.lt.s32.totalorder %s2741_s28, %s2741_s28 }
   0xb   :  { %3017 = vmatprep.subr.mxu1 %v3382_v14  ;;  %3233 = vmatprep.subr.bf16.mxu0 %v3232_v29  ;;  %v2769_v6 = vld [vmem:[%s3812_s1 + $0x20] sm:$0xff] }
   0xc   :  { %2993 = vmatmul.mubr.msk.f32.vlgmr.msra.gmra.mrb[0].mxu0 %vm59_vm0, %v3474_v13  ;;  %v2777_v8 = vld [vmem:[%s3813_s2 + $0x20] sm:$0xff]  ;;  %v3240_v9 = vpack.c.bf16 %v2770_v7, %v2769_v6  ;;  %v2799_v7 = vld [vmem:[%s3818_s7 + $0x8] sm:$0xff] }
   0xd   :  { %3004 = vmatmul.mubr.msk.f32.vlgmr.msra.gmra.mrb[0].mxu1 %vm59_vm0, %v3474_v13  ;;  %3014 = vmatprep.mubr.msk.f32.mxu0 %vm59_vm0, %v3465_v11  ;;  %v3248_v12 = vpack.c.bf16 %v2778_v10, %v2777_v8  ;;  %v2774_v35 = vld [vmem:[%s3815_s4 + $0x1] ss:$0 sm:$0xff] }
   0xe   :  { %3019 = vmatprep.mubr.msk.f32.mxu1 %vm3383_vm1, %v3382_v14  ;;  %3235 = vmatpush3.bf16.msra.mxu0 %v3232_v29  ;;  %v2802_v8 = vld [vmem:[%s3812_s1 + $0x40] sm:$0xff] }
   0xf   :  { %3237 = vmatprep.subr.bf16.mxu0 %v3236_v31  ;;  %v2810_v10 = vld [vmem:[%s3813_s2 + $0x40] sm:$0xff] }
  0x12   :  { %3239 = vmatpush3.bf16.msra.mxu0 %v3236_v31  ;;  %v2790_v31 = vld [vmem:[%s3817_s6 + $0x1] ss:$0 sm:$0xff] }
  0x13   :  { %3037 = vmatprep.subr.mxu0 %v636_v2 }
  0x15   :  { %3015 = vmatmul.mubr.msk.f32.vlgmr.msra.gmra.mrb[2].mxu0 %vm59_vm0, %v3474_v13 }
  0x16   :  { %3038 = vmatpush3.msra.mxu0 %v636_v2 }
  0x17   :  { %3249 = vmatprep.subr.bf16.mxu0 %v3248_v12 }
  0xdf   :  { %v2994_v17 = vpop.f32.mrb[0].mxu0 }
  0xe0   :  { %v138_v18 = vadd.f32 %v2994_v17, %v2752_v15  ;;  %v3005_v19 = vpop.f32.mrb[0].mxu1  ;;  %v132_v20 = vpop.f32.mrb[1].mxu0 }
  0xe1   :  { %v226_v21 = vadd.f32 %v3005_v19, %v2755_v16  ;;  %v133_v22 = vadd.f32 %v2752_v15, %v132_v20  ;;  %v220_v23 = vpop.f32.mrb[1].mxu1  ;;  %v2771_v15 = vld [vmem:[%s3812_s1 + $0x30] sm:$0xff]  ;;  %v2786_v19 = vld [vmem:[%s3814_s3 + $0x28] sm:$0xff] }
  0xe2   :  { %v221_v24 = vadd.f32 %v2755_v16, %v220_v23  ;;  %v142_v54 = vmul.f32 0.35355338, %v138_v18  ;;  %v2772_v16 = vld [vmem:[%s3812_s1 + $0x38] sm:$0xff]  ;;  %v2785_v18 = vld [vmem:[%s3814_s3 + $0x20] sm:$0xff]  ;;  %v2787_v20 = vld [vmem:[%s3814_s3 + $0x30] sm:$0xff] }
  0xe3   :  { %v141_v25 = vmul.f32 0.35355338, %v133_v22  ;;  %v3244_v17 = vpack.c.bf16 %v2772_v16, %v2771_v15  ;;  %v2788_v22 = vld [vmem:[%s3814_s3 + $0x38] sm:$0xff]  ;;  %v2811_v15 = vld [vmem:[%s3813_s2 + $0x48] sm:$0xff] }
  0xe4   :  { %3018 = vmatpush3.xpose.msk.msra.mxu1 %vm315_vm2, %v221_v24  ;;  %v3260_v23 = vpack.c.bf16 %v2788_v22, %v2787_v20  ;;  %v2779_v24 = vld [vmem:[%s3813_s2 + $0x30] sm:$0xff]  ;;  %v3272_v16 = vpack.c.bf16 %v2811_v15, %v2810_v10  ;;  %v2813_v22 = vld [vmem:[%s3813_s2 + $0x58] sm:$0xff]  ;;  %v2843_v15 = vld [vmem:[%s3813_s2 + $0x60] sm:$0xff] }
  0xe5   :  { %3022 = vmatprep.subr.mxu1 %v3382_v14 }
  0xe7   :  { %3020 = vmatmul.mubr.msk.f32.vlgmr.msra.gmra.mrb[2].mxu1 %vm315_vm2, %v141_v25  ;;  %v2780_v25 = vld [vmem:[%s3813_s2 + $0x38] sm:$0xff] }
  0xe8   :  { %3024 = vmatprep.mubr.msk.f32.mxu1 %vm3383_vm1, %v3382_v14  ;;  %v3016_v46 = vpop.f32.mrb[2].mxu0  ;;  %v3252_v26 = vpack.c.bf16 %v2780_v25, %v2779_v24 }
  0xe9   :  { %v306_v48 = vpop.f32.mrb[3].mxu0  ;;  %v312_v49 = vadd.f32 %v3016_v46, %v2758_v47 }
  0xea   :  { %v307_v50 = vadd.f32 %v2758_v47, %v306_v48 }
  0xec   :  { %3023 = vmatpush3.msra.mxu1 %v307_v50 }
  0xed   :  { %3027 = vmatprep.subr.mxu1 %v3382_v14 }
 0x1ba   :  { %v388_v37 = vpop.f32.mrb[2].mxu1 }
 0x1bb   :  { %v389_v38 = vadd.f32 %v388_v37, %v3510_v36  ;;  %v3021_v39 = vpop.f32.mrb[3].mxu1 }
 0x1bd   :  { %v392_v40 = vsel %vm315_vm2, %v389_v38, -inf }
 0x1be   :  { %393 = vmax.xlane.f32.xlu0 %v392_v40 }
 0x24b   :  { %v394_v41 = vpop.xlane.xlu0 %393 }
 0x24c   :  { %v395_v42 = vsub.f32 %v389_v38, %v394_v41  ;;  %v2782_v38 = vld [vmem:[%s3816_s5 + $0x1] ss:$0 sm:$0xff] }
 0x24e   :  { %v396_v43 = vmul.f32 1.442695, %v395_v42 }
 0x250   :  { %3326 = vpow2.f32 %v396_v43 }
 0x25a   :  { %v3327_v44 = vpop.eup %3326 }
 0x25b   :  { %v398_v45 = vsel %vm315_vm2, %v3327_v44, 0.0 }
 0x25c   :  { %399 = vadd.xlane.f32.xlu0 %v398_v45 }
 0x2e9   :  { %v400_v51 = vpop.xlane.xlu0 %399 }
 0x2ea   :  { %3328 = vrcp.f32 %v400_v51 }
 0x2f4   :  { %v3329_v52 = vpop.eup %3328 }
 0x2f5   :  { %v402_v53 = vmul.f32 %v3329_v52, %v3327_v44 }
 0x2f7   :  { %3025 = vmatmul.mubr.msk.f32.vlgmr.msra.gmra.mrb[4].mxu1 %vm315_vm2, %v402_v53 }
 0x2f8   :  { %3028 = vmatpush3.xpose.msk.msra.mxu1 %vm315_vm2, %v226_v21  ;;  %3029 = vmatprep.mubr.msk.f32.mxu1 %vm3383_vm1, %v3382_v14  ;;  %v3256_v21 = vpack.c.bf16 %v2786_v19, %v2785_v18  ;;  %v2805_v18 = vld [vmem:[%s3812_s1 + $0x58] sm:$0xff] }
 0x2f9   :  { %3032 = vmatprep.subr.mxu1 %v3382_v14 }
 0x2fb   :  { %3030 = vmatmul.mubr.msk.f32.vlgmr.msra.gmra.mrb[6].mxu1 %vm315_vm2, %v142_v54 }
 0x2fc   :  { %3033 = vmatpush3.msra.mxu1 %v312_v49  ;;  %3034 = vmatprep.mubr.msk.f32.mxu1 %vm3383_vm1, %v3382_v14 }
 0x2fd   :  { %3241 = vmatprep.subr.bf16.mxu1 %v3240_v9 }
 0x3ca   :  { %v472_v55 = vpop.f32.mrb[4].mxu1 }
 0x3cb   :  { %v3026_v56 = vpop.f32.mrb[5].mxu1  ;;  %3039 = vmatprep.mubr.msk.f32.mxu0 %vm315_vm2, %v472_v55 }
 0x3ce   :  { %v548_v57 = vpop.f32.mrb[6].mxu1 }
 0x3cf   :  { %v549_v58 = vadd.f32 %v548_v57, %v3510_v36  ;;  %v3031_v59 = vpop.f32.mrb[7].mxu1 }
 0x3d1   :  { %v552_v60 = vsel %vm315_vm2, %v549_v58, -inf }
 0x3d2   :  { %553 = vmax.xlane.f32.xlu1 %v552_v60 }
 0x45f   :  { %v554_v61 = vpop.xlane.xlu1 %553 }
 0x460   :  { %v555_v62 = vsub.f32 %v549_v58, %v554_v61 }
 0x462   :  { %v556_v63 = vmul.f32 1.442695, %v555_v62 }
 0x464   :  { %3330 = vpow2.f32 %v556_v63 }
 0x46e   :  { %v3331_v0 = vpop.eup %3330 }
 0x46f   :  { %v558_v1 = vsel %vm315_vm2, %v3331_v0, 0.0 }
 0x470   :  { %559 = vadd.xlane.f32.xlu1 %v558_v1 }
 0x4fd   :  { %v560_v3 = vpop.xlane.xlu1 %559 }
 0x4fe   :  { %3332 = vrcp.f32 %v560_v3 }
 0x508   :  { %v3333_v4 = vpop.eup %3332 }
 0x509   :  { %v562_v5 = vmul.f32 %v3333_v4, %v3331_v0 }
 0x50b   :  { %3035 = vmatmul.mubr.msk.f32.vlgmr.msra.gmra.mrb[8].mxu1 %vm315_vm2, %v562_v5 }
 0x50c   :  { %3050 = vmatprep.mubr.msk.f32.mxu1 %vm59_vm0, %v3465_v11  ;;  %3243 = vmatpush3.bf16.msra.mxu1 %v3240_v9  ;;  %v2803_v9 = vld [vmem:[%s3812_s1 + $0x48] sm:$0xff] }
 0x50d   :  { %3245 = vmatprep.subr.bf16.mxu1 %v3244_v17 }
 0x510   :  { %3247 = vmatpush3.bf16.msra.mxu1 %v3244_v17  ;;  %v2804_v17 = vld [vmem:[%s3812_s1 + $0x50] sm:$0xff] }
 0x511   :  { %3257 = vmatprep.subr.bf16.mxu1 %v3256_v21  ;;  %v3268_v19 = vpack.c.bf16 %v2805_v18, %v2804_v17  ;;  %v2835_v17 = vld [vmem:[%s3812_s1 + $0x60] sm:$0xff] }
 0x513   :  { %3051 = vmatmul.mubr.msk.f32.vlgmr.msra.gmra.mrb[10].mxu1 %vm59_vm0, %v3474_v13 }
 0x514   :  { %3072 = vmatprep.mubr.msk.f32.mxu1 %vm59_vm0, %v3465_v11  ;;  %3259 = vmatpush3.bf16.msra.mxu1 %v3256_v21  ;;  %v2812_v21 = vld [vmem:[%s3813_s2 + $0x50] sm:$0xff] }
 0x515   :  { %3261 = vmatprep.subr.bf16.mxu1 %v3260_v23  ;;  %v3276_v24 = vpack.c.bf16 %v2813_v22, %v2812_v21  ;;  %v2837_v21 = vld [vmem:[%s3812_s1 + $0x70] sm:$0xff]  ;;  %v2838_v22 = vld [vmem:[%s3812_s1 + $0x78] sm:$0xff] }
 0x518   :  { %3263 = vmatpush3.bf16.msra.mxu1 %v3260_v23 }
 0x519   :  { %3085 = vmatprep.subr.mxu1 %v3382_v14 }
 0x51b   :  { %3073 = vmatmul.mubr.msk.f32.vlgmr.msra.gmra.mrb[12].mxu1 %vm59_vm0, %v3474_v13 }
 0x51c   :  { %3087 = vmatprep.mubr.msk.f32.mxu1 %vm3383_vm1, %v3382_v14 }
 0x5de   :  { %v632_v27 = vpop.f32.mrb[8].mxu1 }
 0x5df   :  { %v3036_v28 = vpop.f32.mrb[9].mxu1  ;;  %3040 = vmatmul.mubr.msk.f32.vlgmr.msra.gmra.mrb[4].mxu0 %vm315_vm2, %v632_v27 }
 0x5e0   :  { %3251 = vmatpush3.bf16.msra.mxu0 %v3248_v12  ;;  %3061 = vmatprep.mubr.msk.f32.mxu0 %vm59_vm0, %v3465_v11  ;;  %v3264_v12 = vpack.c.bf16 %v2803_v9, %v2802_v8 }
 0x5e1   :  { %3253 = vmatprep.subr.bf16.mxu0 %v3252_v26 }
 0x5e4   :  { %3255 = vmatpush3.bf16.msra.mxu0 %v3252_v26 }
 0x5e5   :  { %3075 = vmatprep.subr.mxu0 %v3382_v14 }
 0x5e6   :  { %v3052_v29 = vpop.f32.mrb[10].mxu1 }
 0x5e7   :  { %3062 = vmatmul.mubr.msk.f32.vlgmr.msra.gmra.mrb[6].mxu0 %vm59_vm0, %v3474_v13  ;;  %v799_v30 = vpop.f32.mrb[11].mxu1  ;;  %v805_v37 = vadd.f32 %v3052_v29, %v2774_v35  ;;  %v2807_v29 = vld [vmem:[%s3815_s4 + $0x2] ss:$0 sm:$0xff] }
 0x5e8   :  { %3077 = vmatprep.mubr.msk.f32.mxu0 %vm3383_vm1, %v3382_v14  ;;  %v800_v39 = vadd.f32 %v2774_v35, %v799_v30  ;;  %v2815_v30 = vld [vmem:[%s3816_s5 + $0x2] ss:$0 sm:$0xff] }
 0x5e9   :  { %v809_v43 = vmul.f32 0.35355338, %v805_v37 }
 0x5ea   :  { %v808_v45 = vmul.f32 0.35355338, %v800_v39 }
 0x5ee   :  { %v3074_v32 = vpop.f32.mrb[12].mxu1 }
 0x5ef   :  { %v983_v33 = vadd.f32 %v3074_v32, %v2790_v31  ;;  %v977_v34 = vpop.f32.mrb[13].mxu1 }
 0x5f0   :  { %v978_v46 = vadd.f32 %v2790_v31, %v977_v34 }
 0x6ba   :  { %v3063_v40 = vpop.f32.mrb[6].mxu0 }
 0x6bb   :  { %v895_v41 = vadd.f32 %v3063_v40, %v2782_v38  ;;  %v889_v42 = vpop.f32.mrb[7].mxu0  ;;  %v2818_v40 = vld [vmem:[%s3814_s3 + $0x40] sm:$0xff] }
 0x6bc   :  { %v890_v44 = vadd.f32 %v2782_v38, %v889_v42  ;;  %v2820_v42 = vld [vmem:[%s3814_s3 + $0x50] sm:$0xff] }
 0x6bd   :  { %3086 = vmatpush3.xpose.msk.msra.mxu1 %vm315_vm2, %v895_v41  ;;  %v2819_v41 = vld [vmem:[%s3814_s3 + $0x48] sm:$0xff] }
 0x6be   :  { %3076 = vmatpush3.xpose.msk.msra.mxu0 %vm315_vm2, %v890_v44  ;;  %3265 = vmatprep.subr.bf16.mxu1 %v3264_v12  ;;  %v2821_v44 = vld [vmem:[%s3814_s3 + $0x58] sm:$0xff] }
 0x6bf   :  { %3080 = vmatprep.subr.mxu0 %v3382_v14 }
 0x6c0   :  { %3088 = vmatmul.mubr.msk.f32.vlgmr.msra.gmra.mrb[14].mxu1 %vm315_vm2, %v809_v43  ;;  %v3280_v43 = vpack.c.bf16 %v2819_v41, %v2818_v40  ;;  %v2856_v40 = vld [vmem:[%s3817_s6 + $0x3] ss:$0 sm:$0xff] }
 0x6c1   :  { %3078 = vmatmul.mubr.msk.f32.vlgmr.msra.gmra.mrb[8].mxu0 %vm315_vm2, %v808_v45  ;;  %3108 = vmatprep.mubr.msk.f32.mxu1 %vm59_vm0, %v3465_v11  ;;  %v3284_v45 = vpack.c.bf16 %v2821_v44, %v2820_v42 }
 0x6c2   :  { %3081 = vmatpush3.msra.mxu0 %v978_v46  ;;  %3082 = vmatprep.mubr.msk.f32.mxu0 %vm3383_vm1, %v3382_v14 }
 0x6c3   :  { %3090 = vmatprep.subr.mxu0 %v3382_v14  ;;  %3267 = vmatpush3.bf16.msra.mxu1 %v3264_v12  ;;  %v2832_v12 = vld [vmem:[%s3818_s7 + $0x10] sm:$0xff] }
 0x6c4   :  { %3269 = vmatprep.subr.bf16.mxu1 %v3268_v19 }
 0x6c7   :  { %3271 = vmatpush3.bf16.msra.mxu1 %v3268_v19  ;;  %v2836_v19 = vld [vmem:[%s3812_s1 + $0x68] sm:$0xff] }
 0x6c8   :  { %3281 = vmatprep.subr.bf16.mxu1 %v3280_v43 }
 0x6ca   :  { %3109 = vmatmul.mubr.msk.f32.vlgmr.msra.gmra.mrb[16].mxu1 %vm59_vm0, %v3474_v13 }
 0x6cb   :  { %3130 = vmatprep.mubr.msk.f32.mxu1 %vm59_vm0, %v3465_v11  ;;  %3283 = vmatpush3.bf16.msra.mxu1 %v3280_v43 }
 0x6cc   :  { %3285 = vmatprep.subr.bf16.mxu1 %v3284_v45 }
 0x6cf   :  { %3287 = vmatpush3.bf16.msra.mxu1 %v3284_v45 }
 0x6d0   :  { %3138 = vmatprep.subr.mxu1 %v3382_v14 }
 0x6d2   :  { %3131 = vmatmul.mubr.msk.f32.vlgmr.msra.gmra.mrb[18].mxu1 %vm59_vm0, %v3474_v13 }
 0x6d3   :  { %3140 = vmatprep.mubr.msk.f32.mxu1 %vm3383_vm1, %v3382_v14 }
 0x793   :  { %v1218_v47 = vpop.f32.mrb[14].mxu1 }
 0x794   :  { %v1219_v48 = vadd.f32 %v1218_v47, %v3510_v36  ;;  %v1058_v49 = vpop.f32.mrb[8].mxu0  ;;  %v3089_v50 = vpop.f32.mrb[15].mxu1 }
 0x795   :  { %v1059_v51 = vadd.f32 %v1058_v49, %v3510_v36  ;;  %v3079_v52 = vpop.f32.mrb[9].mxu0 }
 0x796   :  { %v1222_v53 = vsel %vm315_vm2, %v1219_v48, -inf }
 0x797   :  { %1223 = vmax.xlane.f32.xlu1 %v1222_v53  ;;  %v1062_v54 = vsel %vm315_vm2, %v1059_v51, -inf }
 0x798   :  { %1063 = vmax.xlane.f32.xlu0 %v1062_v54 }
 0x79d   :  { %v3110_v27 = vpop.f32.mrb[16].mxu1 }
 0x79e   :  { %v1470_v28 = vpop.f32.mrb[17].mxu1  ;;  %v1476_v37 = vadd.f32 %v3110_v27, %v2807_v29 }
 0x79f   :  { %v1471_v31 = vadd.f32 %v2807_v29, %v1470_v28  ;;  %v2854_v28 = vld [vmem:[%s3814_s3 + $0x78] sm:$0xff] }
 0x7a0   :  { %v1480_v39 = vmul.f32 0.35355338, %v1476_v37 }
 0x7a1   :  { %v1479_v35 = vmul.f32 0.35355338, %v1471_v31  ;;  %v2845_v31 = vld [vmem:[%s3813_s2 + $0x70] sm:$0xff] }
 0x824   :  { %v1224_v55 = vpop.xlane.xlu1 %1223 }
 0x825   :  { %v1225_v56 = vsub.f32 %v1219_v48, %v1224_v55  ;;  %v1064_v57 = vpop.xlane.xlu0 %1063 }
 0x826   :  { %v1065_v58 = vsub.f32 %v1059_v51, %v1064_v57 }
 0x827   :  { %v1226_v59 = vmul.f32 1.442695, %v1225_v56 }
 0x828   :  { %v1066_v60 = vmul.f32 1.442695, %v1065_v58 }
 0x829   :  { %3334 = vpow2.f32 %v1226_v59 }
 0x82a   :  { %3336 = vpow2.f32 %v1066_v60 }
 0x833   :  { %v3335_v61 = vpop.eup %3334 }
 0x834   :  { %v3337_v62 = vpop.eup %3336  ;;  %v1228_v63 = vsel %vm315_vm2, %v3335_v61, 0.0 }
 0x835   :  { %1229 = vadd.xlane.f32.xlu1 %v1228_v63  ;;  %v1068_v0 = vsel %vm315_vm2, %v3337_v62, 0.0 }
 0x836   :  { %1069 = vadd.xlane.f32.xlu0 %v1068_v0  ;;  %v3132_v0 = vpop.f32.mrb[18].mxu1 }
 0x8c2   :  { %v1230_v1 = vpop.xlane.xlu1 %1229 }
 0x8c3   :  { %v1070_v2 = vpop.xlane.xlu0 %1069 }
 0x8c4   :  { %3338 = vrcp.f32 %v1070_v2  ;;  %v1648_v2 = vpop.f32.mrb[19].mxu1 }
 0x8c5   :  { %3340 = vrcp.f32 %v1230_v1  ;;  %v2823_v1 = vld [vmem:[%s3817_s6 + $0x2] ss:$0 sm:$0xff] }
 0x8ce   :  { %v3339_v3 = vpop.eup %3338 }
 0x8cf   :  { %v1072_v4 = vmul.f32 %v3339_v3, %v3337_v62  ;;  %v3341_v5 = vpop.eup %3340  ;;  %v1654_v3 = vadd.f32 %v3132_v0, %v2823_v1 }
 0x8d0   :  { %v1232_v6 = vmul.f32 %v3341_v5, %v3335_v61 }
 0x8d1   :  { %3083 = vmatmul.mubr.msk.f32.vlgmr.msra.gmra.mrb[10].mxu0 %vm315_vm2, %v1072_v4  ;;  %v1649_v4 = vadd.f32 %v2823_v1, %v1648_v2 }
 0x8d2   :  { %3091 = vmatpush3.msra.mxu0 %v983_v33  ;;  %3092 = vmatprep.mubr.msk.f32.mxu0 %vm3383_vm1, %v3382_v14 }
 0x8d3   :  { %3095 = vmatprep.subr.mxu0 %v2799_v7  ;;  %3139 = vmatpush3.msra.mxu1 %v1649_v4 }
 0x8d4   :  { %3148 = vmatprep.subr.mxu1 %v3382_v14 }
 0x8d5   :  { %3093 = vmatmul.mubr.msk.f32.vlgmr.msra.gmra.mrb[12].mxu0 %vm315_vm2, %v1232_v6 }
 0x8d6   :  { %3096 = vmatpush3.msra.mxu0 %v2799_v7 }
 0x8d7   :  { %3273 = vmatprep.subr.bf16.mxu0 %v3272_v16 }
 0x9a4   :  { %v1142_v20 = vpop.f32.mrb[10].mxu0 }
 0x9a5   :  { %v3084_v23 = vpop.f32.mrb[11].mxu0  ;;  %3097 = vmatprep.mubr.msk.f32.mxu0 %vm315_vm2, %v1142_v20  ;;  %v3288_v20 = vpack.c.bf16 %v2836_v19, %v2835_v17 }
 0x9a6   :  { %v3292_v23 = vpack.c.bf16 %v2838_v22, %v2837_v21 }
 0x9a8   :  { %v1302_v25 = vpop.f32.mrb[12].mxu0 }
 0x9a9   :  { %v3094_v26 = vpop.f32.mrb[13].mxu0  ;;  %3098 = vmatmul.mubr.msk.f32.vlgmr.msra.gmra.mrb[4].mxu0 %vm315_vm2, %v1302_v25  ;;  %v2852_v25 = vld [vmem:[%s3814_s3 + $0x68] sm:$0xff] }
 0x9aa   :  { %3275 = vmatpush3.bf16.msra.mxu0 %v3272_v16  ;;  %3119 = vmatprep.mubr.msk.f32.mxu0 %vm59_vm0, %v3465_v11  ;;  %v2844_v16 = vld [vmem:[%s3813_s2 + $0x68] sm:$0xff]  ;;  %v2853_v26 = vld [vmem:[%s3814_s3 + $0x70] sm:$0xff] }
 0x9ab   :  { %3277 = vmatprep.subr.bf16.mxu0 %v3276_v24  ;;  %v3296_v18 = vpack.c.bf16 %v2844_v16, %v2843_v15  ;;  %v3308_v29 = vpack.c.bf16 %v2854_v28, %v2853_v26  ;;  %v2865_v15 = vld [vmem:[%s3818_s7 + $0x18] sm:$0xff]  ;;  %s3358_s7 = scalar_lea.vmem %s2741_s28, 256 }
 0x9ac   :  { %p3359_p0 = scmp.ne.s32.totalorder %s2741_s28, %s3358_s7  ;;  %p3364_p2 = scmp.lt.s32.totalorder %s3358_s7, %s3358_s7 }
 0x9ae   :  { %3279 = vmatpush3.bf16.msra.mxu0 %v3276_v24  ;;  %v2851_v24 = vld [vmem:[%s3814_s3 + $0x60] sm:$0xff]  ;;  %p3365_p3 = por %p3364_p2, %p3363_p1 }
 0x9af   :  { %3133 = vmatprep.subr.mxu0 %v3382_v14  ;;  %v3304_v27 = vpack.c.bf16 %v2852_v25, %v2851_v24 }
 0x9b0   :  { %p3366_p4 = pnand %p3365_p3, %p3359_p0 }
 0x9b1   :  { %3120 = vmatmul.mubr.msk.f32.vlgmr.msra.gmra.mrb[14].mxu0 %vm59_vm0, %v3474_v13 }
 0x9b2   :  { %3135 = vmatprep.mubr.msk.f32.mxu0 %vm3383_vm1, %v3382_v14 }
 0xa84   :  { %v3121_v32 = vpop.f32.mrb[14].mxu0 }
 0xa85   :  { %v1560_v33 = vpop.f32.mrb[15].mxu0  ;;  %v1566_v38 = vadd.f32 %v3121_v32, %v2815_v30  ;;  %v2846_v32 = vld [vmem:[%s3813_s2 + $0x78] sm:$0xff] }
 0xa86   :  { %v1561_v34 = vadd.f32 %v2815_v30, %v1560_v33 }
 0xa88   :  { %3134 = vmatpush3.xpose.msk.msra.mxu0 %vm315_vm2, %v1561_v34  ;;  %v3300_v34 = vpack.c.bf16 %v2846_v32, %v2845_v31 }
 0xa89   :  { %3143 = vmatprep.subr.mxu0 %v3382_v14 }
 0xa8b   :  { %3136 = vmatmul.mubr.msk.f32.vlgmr.msra.gmra.mrb[16].mxu0 %vm315_vm2, %v1479_v35 }
 0xa8c   :  { %3144 = vmatpush3.xpose.msk.msra.mxu0 %vm315_vm2, %v1566_v38  ;;  %3145 = vmatprep.mubr.msk.f32.mxu0 %vm3383_vm1, %v3382_v14 }
 0xa8d   :  { %3153 = vmatprep.subr.mxu0 %v2832_v12 }
 0xa8f   :  { %3146 = vmatmul.mubr.msk.f32.vlgmr.msra.gmra.mrb[18].mxu0 %vm315_vm2, %v1480_v39 }
 0xa90   :  { %3154 = vmatpush3.msra.mxu0 %v2832_v12 }
 0xa91   :  { %3297 = vmatprep.subr.bf16.mxu0 %v3296_v18 }
 0xb5e   :  { %v1729_v46 = vpop.f32.mrb[16].mxu0 }
 0xb5f   :  { %v1730_v47 = vadd.f32 %v1729_v46, %v3510_v36  ;;  %v3137_v48 = vpop.f32.mrb[17].mxu0 }
 0xb61   :  { %v1733_v49 = vsel %vm315_vm2, %v1730_v47, -inf }
 0xb62   :  { %1734 = vmax.xlane.f32.xlu0 %v1733_v49  ;;  %v1889_v50 = vpop.f32.mrb[18].mxu0 }
 0xb63   :  { %v1890_v51 = vadd.f32 %v1889_v50, %v3510_v36  ;;  %v3147_v52 = vpop.f32.mrb[19].mxu0 }
 0xb65   :  { %v1893_v53 = vsel %vm315_vm2, %v1890_v51, -inf }
 0xb66   :  { %1894 = vmax.xlane.f32.xlu1 %v1893_v53 }
 0xbef   :  { %v1735_v54 = vpop.xlane.xlu0 %1734 }
 0xbf0   :  { %v1736_v55 = vsub.f32 %v1730_v47, %v1735_v54 }
 0xbf2   :  { %v1737_v56 = vmul.f32 1.442695, %v1736_v55 }
 0xbf3   :  { %v1895_v57 = vpop.xlane.xlu1 %1894 }
 0xbf4   :  { %3342 = vpow2.f32 %v1737_v56  ;;  %v1896_v58 = vsub.f32 %v1890_v51, %v1895_v57 }
 0xbf6   :  { %v1897_v59 = vmul.f32 1.442695, %v1896_v58 }
 0xbf8   :  { %3344 = vpow2.f32 %v1897_v59 }
 0xbfe   :  { %v3343_v60 = vpop.eup %3342 }
 0xbff   :  { %v1739_v61 = vsel %vm315_vm2, %v3343_v60, 0.0 }
 0xc00   :  { %1740 = vadd.xlane.f32.xlu0 %v1739_v61 }
 0xc02   :  { %v3345_v62 = vpop.eup %3344 }
 0xc03   :  { %v1899_v63 = vsel %vm315_vm2, %v3345_v62, 0.0 }
 0xc04   :  { %1900 = vadd.xlane.f32.xlu1 %v1899_v63 }
 0xc8d   :  { %v1741_v5 = vpop.xlane.xlu0 %1740 }
 0xc8e   :  { %3346 = vrcp.f32 %v1741_v5 }
 0xc91   :  { %v1901_v6 = vpop.xlane.xlu1 %1900 }
 0xc92   :  { %3348 = vrcp.f32 %v1901_v6 }
 0xc98   :  { %v3347_v7 = vpop.eup %3346 }
 0xc99   :  { %v1743_v8 = vmul.f32 %v3347_v7, %v3343_v60 }
 0xc9b   :  { %3141 = vmatmul.mubr.msk.f32.vlgmr.msra.gmra.mrb[20].mxu1 %vm315_vm2, %v1743_v8 }
 0xc9c   :  { %v3349_v9 = vpop.eup %3348  ;;  %3149 = vmatpush3.msra.mxu1 %v1654_v3  ;;  %3150 = vmatprep.mubr.msk.f32.mxu1 %vm3383_vm1, %v3382_v14 }
 0xc9d   :  { %v1903_v10 = vmul.f32 %v3349_v9, %v3345_v62  ;;  %3289 = vmatprep.subr.bf16.mxu1 %v3288_v20 }
 0xc9f   :  { %3151 = vmatmul.mubr.msk.f32.vlgmr.msra.gmra.mrb[22].mxu1 %vm315_vm2, %v1903_v10 }
 0xca0   :  { %3166 = vmatprep.mubr.msk.f32.mxu1 %vm59_vm0, %v3465_v11  ;;  %3291 = vmatpush3.bf16.msra.mxu1 %v3288_v20 }
 0xca1   :  { %3293 = vmatprep.subr.bf16.mxu1 %v3292_v23 }
 0xca4   :  { %3295 = vmatpush3.bf16.msra.mxu1 %v3292_v23 }
 0xca5   :  { %3305 = vmatprep.subr.bf16.mxu1 %v3304_v27 }
 0xca7   :  { %3167 = vmatmul.mubr.msk.f32.vlgmr.msra.gmra.mrb[24].mxu1 %vm59_vm0, %v3474_v13 }
 0xca8   :  { %3188 = vmatprep.mubr.msk.f32.mxu1 %vm59_vm0, %v3465_v11  ;;  %3307 = vmatpush3.bf16.msra.mxu1 %v3304_v27 }
 0xca9   :  { %3309 = vmatprep.subr.bf16.mxu1 %v3308_v29 }
 0xcac   :  { %3311 = vmatpush3.bf16.msra.mxu1 %v3308_v29 }
 0xcad   :  { %3201 = vmatprep.subr.mxu1 %v3382_v14 }
 0xcaf   :  { %3189 = vmatmul.mubr.msk.f32.vlgmr.msra.gmra.mrb[26].mxu1 %vm59_vm0, %v3474_v13 }
 0xcb0   :  { %3203 = vmatprep.mubr.msk.f32.mxu1 %vm3383_vm1, %v3382_v14 }
 0xd6e   :  { %v1813_v30 = vpop.f32.mrb[20].mxu1 }
 0xd6f   :  { %v3142_v33 = vpop.f32.mrb[21].mxu1  ;;  %3155 = vmatprep.mubr.msk.f32.mxu0 %vm315_vm2, %v1813_v30 }
 0xd72   :  { %v1973_v35 = vpop.f32.mrb[22].mxu1 }
 0xd73   :  { %v3152_v37 = vpop.f32.mrb[23].mxu1  ;;  %3156 = vmatmul.mubr.msk.f32.vlgmr.msra.gmra.mrb[4].mxu0 %vm315_vm2, %v1973_v35 }
 0xd74   :  { %3299 = vmatpush3.bf16.msra.mxu0 %v3296_v18  ;;  %3177 = vmatprep.mubr.msk.f32.mxu0 %vm59_vm0, %v3465_v11  ;;  %v2840_v11 = vld [vmem:[%s3815_s4 + $0x3] ss:$0 sm:$0xff] }
 0xd75   :  { %3301 = vmatprep.subr.bf16.mxu0 %v3300_v34 }
 0xd78   :  { %3303 = vmatpush3.bf16.msra.mxu0 %v3300_v34 }
 0xd79   :  { %3191 = vmatprep.subr.mxu0 %v3382_v14 }
 0xd7a   :  { %v3168_v38 = vpop.f32.mrb[24].mxu1 }
 0xd7b   :  { %3178 = vmatmul.mubr.msk.f32.vlgmr.msra.gmra.mrb[20].mxu0 %vm59_vm0, %v3474_v13  ;;  %v2141_v39 = vpop.f32.mrb[25].mxu1  ;;  %v2848_v13 = vld [vmem:[%s3816_s5 + $0x3] ss:$0 sm:$0xff]  ;;  %v2147_v44 = vadd.f32 %v3168_v38, %v2840_v11 }
 0xd7c   :  { %3193 = vmatprep.mubr.msk.f32.mxu0 %vm3383_vm1, %v3382_v14  ;;  %v2142_v45 = vadd.f32 %v2840_v11, %v2141_v39 }
 0xd7d   :  { %v2151_v49 = vmul.f32 0.35355338, %v2147_v44 }
 0xd7e   :  { %v2150_v51 = vmul.f32 0.35355338, %v2142_v45 }
 0xd82   :  { %v3190_v41 = vpop.f32.mrb[26].mxu1 }
 0xd83   :  { %v2325_v42 = vadd.f32 %v3190_v41, %v2856_v40  ;;  %v2319_v43 = vpop.f32.mrb[27].mxu1 }
 0xd84   :  { %v2320_v52 = vadd.f32 %v2856_v40, %v2319_v43 }
 0xe4e   :  { %v3179_v46 = vpop.f32.mrb[20].mxu0 }
 0xe4f   :  { %v2237_v47 = vadd.f32 %v3179_v46, %v2848_v13  ;;  %v2231_v48 = vpop.f32.mrb[21].mxu0 }
 0xe50   :  { %v2232_v50 = vadd.f32 %v2848_v13, %v2231_v48 }
 0xe51   :  { %3202 = vmatpush3.xpose.msk.msra.mxu1 %vm315_vm2, %v2237_v47 }
 0xe52   :  { %3192 = vmatpush3.xpose.msk.msra.mxu0 %vm315_vm2, %v2232_v50 }
 0xe53   :  { %3196 = vmatprep.subr.mxu0 %v3382_v14 }
 0xe54   :  { %3204 = vmatmul.mubr.msk.f32.vlgmr.msra.gmra.mrb[28].mxu1 %vm315_vm2, %v2151_v49 }
 0xe55   :  { %3194 = vmatmul.mubr.msk.f32.vlgmr.msra.gmra.mrb[22].mxu0 %vm315_vm2, %v2150_v51 }
 0xe56   :  { %3197 = vmatpush3.msra.mxu0 %v2320_v52  ;;  %3198 = vmatprep.mubr.msk.f32.mxu0 %vm3383_vm1, %v3382_v14 }
 0xe57   :  { %3206 = vmatprep.subr.mxu0 %v3382_v14 }
 0xf27   :  { %v2560_v53 = vpop.f32.mrb[28].mxu1 }
 0xf28   :  { %v2561_v54 = vadd.f32 %v2560_v53, %v3510_v36  ;;  %v2400_v55 = vpop.f32.mrb[22].mxu0  ;;  %v3205_v56 = vpop.f32.mrb[29].mxu1 }
 0xf29   :  { %v2401_v57 = vadd.f32 %v2400_v55, %v3510_v36  ;;  %v3195_v58 = vpop.f32.mrb[23].mxu0 }
 0xf2a   :  { %v2564_v59 = vsel %vm315_vm2, %v2561_v54, -inf }
 0xf2b   :  { %2565 = vmax.xlane.f32.xlu1 %v2564_v59  ;;  %v2404_v60 = vsel %vm315_vm2, %v2401_v57, -inf }
 0xf2c   :  { %2405 = vmax.xlane.f32.xlu0 %v2404_v60 }
 0xfb8   :  { %v2566_v61 = vpop.xlane.xlu1 %2565 }
 0xfb9   :  { %v2567_v62 = vsub.f32 %v2561_v54, %v2566_v61  ;;  %v2406_v63 = vpop.xlane.xlu0 %2405 }
 0xfba   :  { %v2407_v0 = vsub.f32 %v2401_v57, %v2406_v63 }
 0xfbb   :  { %v2568_v1 = vmul.f32 1.442695, %v2567_v62 }
 0xfbc   :  { %v2408_v2 = vmul.f32 1.442695, %v2407_v0 }
 0xfbd   :  { %3350 = vpow2.f32 %v2568_v1 }
 0xfbe   :  { %3352 = vpow2.f32 %v2408_v2 }
 0xfc7   :  { %v3351_v3 = vpop.eup %3350 }
 0xfc8   :  { %v3353_v4 = vpop.eup %3352  ;;  %v2570_v5 = vsel %vm315_vm2, %v3351_v3, 0.0 }
 0xfc9   :  { %2571 = vadd.xlane.f32.xlu1 %v2570_v5  ;;  %v2410_v36 = vsel %vm315_vm2, %v3353_v4, 0.0 }
 0xfca   :  { %2411 = vadd.xlane.f32.xlu0 %v2410_v36 }
0x1056   :  { %v2572_v6 = vpop.xlane.xlu1 %2571 }
0x1057   :  { %v2412_v7 = vpop.xlane.xlu0 %2411 }
0x1058   :  { %3354 = vrcp.f32 %v2412_v7 }
0x1059   :  { %3356 = vrcp.f32 %v2572_v6 }
0x1062   :  { %v3355_v8 = vpop.eup %3354 }
0x1063   :  { %v2414_v9 = vmul.f32 %v3355_v8, %v3353_v4  ;;  %v3357_v10 = vpop.eup %3356 }
0x1064   :  { %v2574_v12 = vmul.f32 %v3357_v10, %v3351_v3 }
0x1065   :  { %3199 = vmatmul.mubr.msk.f32.vlgmr.msra.gmra.mrb[24].mxu0 %vm315_vm2, %v2414_v9 }
0x1066   :  { %3207 = vmatpush3.msra.mxu0 %v2325_v42  ;;  %3208 = vmatprep.mubr.msk.f32.mxu0 %vm3383_vm1, %v3382_v14  ;;  %v2751_v14 = vld [vmem:[%s3819_s8] ss:$0 sm:$0xff] }
0x1067   :  { %3211 = vmatprep.subr.mxu0 %v2865_v15 }
0x1069   :  { %3209 = vmatmul.mubr.msk.f32.vlgmr.msra.gmra.mrb[26].mxu0 %vm315_vm2, %v2574_v12 }
0x106a   :  { %3212 = vmatpush3.msra.mxu0 %v2865_v15 }
0x1138   :  { %v2484_v16 = vpop.f32.mrb[24].mxu0 }
0x1139   :  { %v3200_v17 = vpop.f32.mrb[25].mxu0  ;;  %3213 = vmatprep.mubr.msk.f32.mxu0 %vm315_vm2, %v2484_v16 }
0x113c   :  { %v2644_v18 = vpop.f32.mrb[26].mxu0 }
0x113d   :  { %v3210_v19 = vpop.f32.mrb[27].mxu0  ;;  %3214 = vmatmul.mubr.msk.f32.vlgmr.msra.gmra.mrb[4].mxu0 %vm315_vm2, %v2644_v18 }
0x1210   :  { %v3215_v20 = vpop.f32.mrb[4].mxu0 }
0x1211   :  { %v3312_v21 = vadd.f32 %v3215_v20, %v2751_v14  ;;  %v2722_v22 = vpop.f32.mrb[5].mxu0 }
0x1212   :  { %v3313_v23 = vadd.f32 %v2751_v14, %v2722_v22 }
0x1213   :  { %2734 = vst.msk [vmem:[#allocation2 + $0x8] sm:$0xff] %vm59_vm0, %v3312_v21 }
0x1214   :  { %2733 = vst.msk [vmem:[#allocation2] sm:$0xff] %vm59_vm0, %v3313_v23 }
0x1215   :  { %3369 = shalt.err (!%p3366_p4)
}
0x1216   :  { %s3370_s0 = scalar_lea.hbm %s3820_s9, 256 }
0x1217   :  { %p3371_p5 = scmp.ne.s32.totalorder %s3820_s9, %s3370_s0  ;;  %p3374_p6 = scmp.lt.u32.totalorder %s3370_s0, %s3820_s9 }
0x1219   :  { %p3376_p7 = pnand %p3374_p6, %p3371_p5 }
0x121b   :  { %3379 = shalt.err (!%p3376_p7)
}
0x121c   :  { %s3386_s13 = smov 128   ;;  %s3387_s14 = smov 8  }
0x121d   :  { %2746 = dma.vmem_to_hbm [thread:$0]  %s2741_s28, 256, %s3820_s9, [#allocation3], %s3386_s13, %s3386_s13, %s3387_s14  }
0x121e   :  { %3380 = dma.done.wait [#allocation3], 256  }
0x121f   :  { %3381 = vsyncadd [#allocation3], 4294967040 }
0x1220   :  { %2750 = vsyncpa [#allocation3], 1 }

</bundles_post_ra>
